<compile_context>
chip_gen: v7x
topology: tpu7x:2x2x1
jax: 0.10.0
libtpu: 0.0.40
codegen_flags: <defaults>
</compile_context>

<pallas_src>
import functools

import jax
import jax.numpy as jnp
from jax.experimental import pallas as pl
from jax.experimental.pallas import tpu as pltpu

COMPUTE_LANES = 128   # in-kernel padded logits width (one full lane vreg)
PAD_OUT = 8           # stored output width (>= output_dim, minimal f32 sublane tile)
NEG_INF = -1e30       # mask value baked into padded bias columns
MAX_TILE_B = 1024     # batch-tile cap


def _round_up(n, m):
    return ((n + m - 1) // m) * m


def _pick_tile_b(batch):
    """Batch tile: multiple of 8, <= MAX_TILE_B, >= 2 tiles when batch allows (v7x megacore)."""
    b8 = _round_up(max(batch, 1), 8)
    if b8 < 16:
        return 8
    half = _round_up(pl.cdiv(b8, 2), 8)
    return min(MAX_TILE_B, half)


def policy_kernel(x_ref, w1_ref, b1_ref, w2_ref, b2_ref, o_ref):
    x = x_ref[...]                       # [TB, d_in] f32
    d_in = x.shape[1]

    # Hidden layer: K = d_in (= 4) is tiny -> unrolled VPU FMAs, skip the MXU round trip.
    h = b1_ref[...]                      # [1, H] -> broadcasts up to [TB, H]
    for k in range(d_in):                # static unroll
        h = h + x[:, k:k + 1] * w1_ref[k:k + 1, :]
    h = jnp.maximum(h, 0.0)              # ReLU

    # Output layer: one clean MXU tile [TB, H] x [H, 128]. Padded bias columns are -1e30,
    # so padded logits vanish from the softmax max/sum without any extra masking ops.
    logits = jnp.dot(h, w2_ref[...], preferred_element_type=jnp.float32) + b2_ref[...]

    # Numerically stable log-softmax over the last dim.
    m = jnp.max(logits, axis=-1, keepdims=True)
    s = logits - m
    lse = jnp.log(jnp.sum(jnp.exp(s), axis=-1, keepdims=True))

    # Store only the first PAD_OUT lanes (real log-probs live in columns [0, d_out)).
    o_ref[...] = (s - lse)[:, :PAD_OUT]


def init_params(key, input_dim, hidden_dim, output_dim):
    # Deterministic init mimicking PyTorch nn.Linear default (uniform +/- 1/sqrt(fan_in)).
    k1, k2, k3, k4 = jax.random.split(key, 4)
    bound1 = 1.0 / jnp.sqrt(jnp.float32(input_dim))
    bound2 = 1.0 / jnp.sqrt(jnp.float32(hidden_dim))
    # Stored as [in, out] (transposed relative to PyTorch's [out, in]).
    w1 = jax.random.uniform(k1, (input_dim, hidden_dim), jnp.float32, -bound1, bound1)
    b1 = jax.random.uniform(k2, (1, hidden_dim), jnp.float32, -bound1, bound1)
    w2 = jax.random.uniform(k3, (hidden_dim, output_dim), jnp.float32, -bound2, bound2)
    b2 = jax.random.uniform(k4, (1, output_dim), jnp.float32, -bound2, bound2)
    return w1, b1, w2, b2


def pad_params(w1, b1, w2, b2):
    """One-time (param-load-time) padding of the second layer to lane width 128.
    Padded bias columns carry -1e30 so they vanish from the in-kernel softmax."""
    hidden, d_out = w2.shape
    assert d_out <= PAD_OUT <= COMPUTE_LANES
    w2p = jnp.zeros((hidden, COMPUTE_LANES), jnp.float32).at[:, :d_out].set(w2)
    b2p = (jnp.full((1, COMPUTE_LANES), NEG_INF, jnp.float32)
           .at[:, :d_out].set(jnp.reshape(b2, (1, d_out))))
    w1p = jnp.asarray(w1, jnp.float32)
    b1p = jnp.reshape(jnp.asarray(b1, jnp.float32), (1, hidden))
    return w1p, b1p, w2p, b2p


@functools.partial(jax.jit, static_argnames=("d_out",))
def policy_forward(x, w1, b1, w2p, b2p, *, d_out):
    """x: [B, d_in] f32. w1: [d_in, H], b1: [1, H], w2p: [H, 128], b2p: [1, 128] (padded)."""
    B, d_in = x.shape
    hidden = w1.shape[1]

    tile_b = _pick_tile_b(B)
    b_pad = _round_up(B, tile_b)
    if b_pad != B:
        # Fused under this jit; only hit when B is not a tile multiple.
        x = jnp.pad(x, ((0, b_pad - B), (0, 0)))
    n_tiles = b_pad // tile_b

    out = pl.pallas_call(
        policy_kernel,
        out_shape=jax.ShapeDtypeStruct((b_pad, PAD_OUT), jnp.float32),
        grid=(n_tiles,),
        in_specs=[
            pl.BlockSpec((tile_b, d_in), lambda i: (i, 0)),           # x tile
            pl.BlockSpec((d_in, hidden), lambda i: (0, 0)),           # w1 (whole)
            pl.BlockSpec((1, hidden), lambda i: (0, 0)),              # b1 (whole)
            pl.BlockSpec((hidden, COMPUTE_LANES), lambda i: (0, 0)),  # w2 padded (whole)
            pl.BlockSpec((1, COMPUTE_LANES), lambda i: (0, 0)),       # b2 padded + masked
        ],
        out_specs=pl.BlockSpec((tile_b, PAD_OUT), lambda i: (i, 0)),
        compiler_params=pltpu.CompilerParams(
            dimension_semantics=("parallel",),   # shards the batch grid across v7x's 2 TCs
        ),
    )(x, w1, b1, w2p, b2p)

    return out[:B, :d_out]


def _reference(x, w1, b1, w2, b2):
    h = jnp.maximum(x @ w1 + b1, 0.0)
    return jax.nn.log_softmax(h @ w2 + b2, axis=-1)


if __name__ == "__main__":
    # CartPole-like dims: observation dim 4, action dim 2.
    input_dim, hidden_dim, output_dim = 4, 64, 2

    key = jax.random.PRNGKey(0)
    kx, kp, kb = jax.random.split(key, 3)
    w1, b1, w2, b2 = init_params(kp, input_dim, hidden_dim, output_dim)
    w1p, b1p, w2p, b2p = pad_params(w1, b1, w2, b2)   # hoisted, done once

    # Per-step RL path (small batch).
    x_small = jax.random.normal(kx, (8, input_dim), jnp.float32)
    out_small = jax.block_until_ready(
        policy_forward(x_small, w1p, b1p, w2p, b2p, d_out=output_dim))
    ref_small = _reference(x_small, w1, b1, w2, b2)
    assert out_small.shape == (8, output_dim)
    assert jnp.allclose(out_small, ref_small, atol=1e-5, rtol=1e-5), "mismatch (B=8)"

    # Rollout-sized, non-multiple-of-tile batch: exercises the 2-tile parallel grid
    # (one tile per v7x TensorCore) and the fused in-jit batch pad.
    x_big = jax.random.normal(kb, (250, input_dim), jnp.float32)
    out_big = jax.block_until_ready(
        policy_forward(x_big, w1p, b1p, w2p, b2p, d_out=output_dim))
    ref_big = _reference(x_big, w1, b1, w2, b2)
    assert out_big.shape == (250, output_dim)
    assert jnp.allclose(out_big, ref_big, atol=1e-5, rtol=1e-5), "mismatch (B=250)"

    print("KERNEL_OK")
</pallas_src>

<mosaic_0001>
module attributes {stable_mosaic.version = 11 : i64} {
  func.func @policy_kernel(%arg0: i32, %arg1: memref<8x4xf32, #tpu.memory_space<vmem>>, %arg2: memref<4x64xf32, #tpu.memory_space<vmem>>, %arg3: memref<1x64xf32, #tpu.memory_space<vmem>>, %arg4: memref<64x128xf32, #tpu.memory_space<vmem>>, %arg5: memref<1x128xf32, #tpu.memory_space<vmem>>, %arg6: memref<8x8xf32, #tpu.memory_space<vmem>>) attributes {dimension_semantics = [#tpu.dimension_semantics<parallel>], iteration_bounds = array<i64: 1>, scalar_prefetch = 0 : i64, scratch_operands = 0 : i64, tpu.core_type = #tpu.core_type<tc>, window_params = [{transform_indices = @transform_0, window_bounds = array<i64: 8, 4>}, {pipeline_mode = #tpu.pipeline_mode<synchronous>, transform_indices = @transform_1, window_bounds = array<i64: 4, 64>}, {pipeline_mode = #tpu.pipeline_mode<synchronous>, transform_indices = @transform_2, window_bounds = array<i64: 1, 64>}, {pipeline_mode = #tpu.pipeline_mode<synchronous>, transform_indices = @transform_3, window_bounds = array<i64: 64, 128>}, {pipeline_mode = #tpu.pipeline_mode<synchronous>, transform_indices = @transform_4, window_bounds = array<i64: 1, 128>}, {transform_indices = @transform_5, window_bounds = array<i64: 8, 8>}]} {
    %c0 = arith.constant 0 : index
    %c0_0 = arith.constant 0 : index
    %0 = vector.load %arg1[%c0, %c0_0] : memref<8x4xf32, #tpu.memory_space<vmem>>, vector<8x4xf32>
    %c0_1 = arith.constant 0 : index
    %c0_2 = arith.constant 0 : index
    %1 = vector.load %arg3[%c0_1, %c0_2] : memref<1x64xf32, #tpu.memory_space<vmem>>, vector<1x64xf32>
    %2 = vector.extract_strided_slice %0 {offsets = [0, 0], sizes = [8, 1], strides = [1, 1]} : vector<8x4xf32> to vector<8x1xf32>
    %c0_3 = arith.constant 0 : index
    %c0_4 = arith.constant 0 : index
    %3 = vector.load %arg2[%c0_3, %c0_4] : memref<4x64xf32, #tpu.memory_space<vmem>>, vector<1x64xf32>
    %4 = vector.broadcast %2 : vector<8x1xf32> to vector<8x64xf32>
    %5 = vector.broadcast %3 : vector<1x64xf32> to vector<8x64xf32>
    %6 = arith.mulf %4, %5 : vector<8x64xf32>
    %7 = vector.broadcast %1 : vector<1x64xf32> to vector<8x64xf32>
    %8 = arith.addf %7, %6 : vector<8x64xf32>
    %9 = vector.extract_strided_slice %0 {offsets = [0, 1], sizes = [8, 1], strides = [1, 1]} : vector<8x4xf32> to vector<8x1xf32>
    %c1 = arith.constant 1 : index
    %c0_5 = arith.constant 0 : index
    %10 = vector.load %arg2[%c1, %c0_5] : memref<4x64xf32, #tpu.memory_space<vmem>>, vector<1x64xf32>
    %11 = vector.broadcast %9 : vector<8x1xf32> to vector<8x64xf32>
    %12 = vector.broadcast %10 : vector<1x64xf32> to vector<8x64xf32>
    %13 = arith.mulf %11, %12 : vector<8x64xf32>
    %14 = arith.addf %8, %13 : vector<8x64xf32>
    %15 = vector.extract_strided_slice %0 {offsets = [0, 2], sizes = [8, 1], strides = [1, 1]} : vector<8x4xf32> to vector<8x1xf32>
    %c2 = arith.constant 2 : index
    %c0_6 = arith.constant 0 : index
    %16 = vector.load %arg2[%c2, %c0_6] : memref<4x64xf32, #tpu.memory_space<vmem>>, vector<1x64xf32>
    %17 = vector.broadcast %15 : vector<8x1xf32> to vector<8x64xf32>
    %18 = vector.broadcast %16 : vector<1x64xf32> to vector<8x64xf32>
    %19 = arith.mulf %17, %18 : vector<8x64xf32>
    %20 = arith.addf %14, %19 : vector<8x64xf32>
    %21 = vector.extract_strided_slice %0 {offsets = [0, 3], sizes = [8, 1], strides = [1, 1]} : vector<8x4xf32> to vector<8x1xf32>
    %c3 = arith.constant 3 : index
    %c0_7 = arith.constant 0 : index
    %22 = vector.load %arg2[%c3, %c0_7] : memref<4x64xf32, #tpu.memory_space<vmem>>, vector<1x64xf32>
    %23 = vector.broadcast %21 : vector<8x1xf32> to vector<8x64xf32>
    %24 = vector.broadcast %22 : vector<1x64xf32> to vector<8x64xf32>
    %25 = arith.mulf %23, %24 : vector<8x64xf32>
    %26 = arith.addf %20, %25 : vector<8x64xf32>
    %cst = arith.constant 0.000000e+00 : f32
    %27 = vector.broadcast %cst : f32 to vector<8x64xf32>
    %28 = arith.maximumf %26, %27 : vector<8x64xf32>
    %c0_8 = arith.constant 0 : index
    %c0_9 = arith.constant 0 : index
    %29 = vector.load %arg4[%c0_8, %c0_9] : memref<64x128xf32, #tpu.memory_space<vmem>>, vector<64x128xf32>
    %cst_10 = arith.constant dense<0.000000e+00> : vector<8x128xf32>
    %30 = tpu.matmul %28, %29, %cst_10 {dimension_numbers = #tpu.dot_dimension_numbers<[1], [0], [0], [1], [0, 0, 1, 1], [], []>} : vector<8x64xf32>, vector<64x128xf32>, vector<8x128xf32> -> vector<8x128xf32>
    %c0_11 = arith.constant 0 : index
    %c0_12 = arith.constant 0 : index
    %31 = vector.load %arg5[%c0_11, %c0_12] : memref<1x128xf32, #tpu.memory_space<vmem>>, vector<1x128xf32>
    %32 = vector.broadcast %31 : vector<1x128xf32> to vector<8x128xf32>
    %33 = arith.addf %30, %32 : vector<8x128xf32>
    %cst_13 = arith.constant dense<0xFF800000> : vector<8xf32>
    %34 = vector.multi_reduction <maximumf>, %33, %cst_13 [1] : vector<8x128xf32> to vector<8xf32>
    %35 = vector.shape_cast %34 : vector<8xf32> to vector<8x1xf32>
    %36 = vector.broadcast %35 : vector<8x1xf32> to vector<8x128xf32>
    %37 = arith.subf %33, %36 : vector<8x128xf32>
    %38 = math.exp %37 : vector<8x128xf32>
    %cst_14 = arith.constant dense<0.000000e+00> : vector<8xf32>
    %39 = vector.multi_reduction <add>, %38, %cst_14 [1] : vector<8x128xf32> to vector<8xf32>
    %40 = vector.shape_cast %39 : vector<8xf32> to vector<8x1xf32>
    %41 = math.log %40 : vector<8x1xf32>
    %42 = vector.broadcast %41 : vector<8x1xf32> to vector<8x128xf32>
    %43 = arith.subf %37, %42 : vector<8x128xf32>
    %44 = vector.extract_strided_slice %43 {offsets = [0, 0], sizes = [8, 8], strides = [1, 1]} : vector<8x128xf32> to vector<8x8xf32>
    %c0_15 = arith.constant 0 : index
    %c0_16 = arith.constant 0 : index
    %45 = vector.load %arg6[%c0_15, %c0_16] : memref<8x8xf32, #tpu.memory_space<vmem>>, vector<8x8xf32>
    tpu.vector_store %arg6[%c0_15, %c0_16], %44 {strides = array<i32>} : memref<8x8xf32, #tpu.memory_space<vmem>>, vector<8x8xf32>,
    return
  }
  func.func @transform_0(%arg0: i32) -> (i32, i32) {
    %c0_i32 = arith.constant 0 : i32
    %c0_i32_0 = arith.constant 0 : i32
    return %arg0, %c0_i32 : i32, i32
  }
  func.func @transform_1(%arg0: i32) -> (i32, i32) {
    %c0_i32 = arith.constant 0 : i32
    %c0_i32_0 = arith.constant 0 : i32
    %c0_i32_1 = arith.constant 0 : i32
    return %c0_i32, %c0_i32_0 : i32, i32
  }
  func.func @transform_2(%arg0: i32) -> (i32, i32) {
    %c0_i32 = arith.constant 0 : i32
    %c0_i32_0 = arith.constant 0 : i32
    %c0_i32_1 = arith.constant 0 : i32
    return %c0_i32, %c0_i32_0 : i32, i32
  }
  func.func @transform_3(%arg0: i32) -> (i32, i32) {
    %c0_i32 = arith.constant 0 : i32
    %c0_i32_0 = arith.constant 0 : i32
    %c0_i32_1 = arith.constant 0 : i32
    return %c0_i32, %c0_i32_0 : i32, i32
  }
  func.func @transform_4(%arg0: i32) -> (i32, i32) {
    %c0_i32 = arith.constant 0 : i32
    %c0_i32_0 = arith.constant 0 : i32
    %c0_i32_1 = arith.constant 0 : i32
    return %c0_i32, %c0_i32_0 : i32, i32
  }
  func.func @transform_5(%arg0: i32) -> (i32, i32) {
    %c0_i32 = arith.constant 0 : i32
    %c0_i32_0 = arith.constant 0 : i32
    return %arg0, %c0_i32 : i32, i32
  }
}

</mosaic_0001>

<bundles_post_ra>
// kernel: policy_forward.1
= control target key start
LH: loop header
LB: loop body
LE: loop exit
PB: predicated region body
PF: predicated region fallthrough
CT: control target
= control target key end

     0   :  { %10 = vsyncpa [#allocation3], 0  ;;  %s284_s18 = smov [#allocation2]   ;;  %s360_s0 = inlined_call_operand.vmem [shape: f32[8,4], index: 0, kind: input, shape index: {}]   ;;  %s361_s1 = inlined_call_operand.vmem [shape: f32[4,64], index: 1, kind: input, shape index: {}]   ;;  %s362_s2 = inlined_call_operand.vmem [shape: f32[1,64], index: 2, kind: input, shape index: {}]   ;;  %s363_s3 = inlined_call_operand.hbm [shape: f32[64,128], index: 3, kind: input, shape index: {}]   ;;  %s364_s4 = inlined_call_operand.vmem [shape: f32[1,128], index: 4, kind: input, shape index: {}]   ;;  %s365_s5 = inlined_call_operand.vmem [shape: f32[8,8], index: 5, kind: output, shape index: {}]  }
   0x1   :  { %s22_s19 = sshll.u32 %s284_s18, 4  ;;  %s260_s22 = scalar_lea.hbm %s363_s3, 1024  ;;  %s23_s19 = int_to_ptr.vmem [resolvable:$true] %s22_s19 }
   0x2   :  { %p261_p0 = scmp.ne.s32.totalorder %s363_s3, %s260_s22  ;;  %p264_p1 = scmp.lt.u32.totalorder %s260_s22, %s363_s3 }
   0x4   :  { %p266_p2 = pnand %p264_p1, %p261_p0 }
   0x6   :  { %269 = shalt.err (!%p266_p2)
}
   0x7   :  { %s270_s27 = scalar_lea.vmem %s23_s19, 1024  ;;  %p275_p4 = scmp.lt.s32.totalorder %s23_s19, %s23_s19 }
   0x8   :  { %p271_p3 = scmp.ne.s32.totalorder %s23_s19, %s270_s27  ;;  %p276_p5 = scmp.lt.s32.totalorder %s270_s27, %s270_s27 }
   0xa   :  { %p277_p6 = por %p276_p5, %p275_p4 }
   0xc   :  { %p278_p7 = pnand %p277_p6, %p271_p3 }
   0xe   :  { %281 = shalt.err (!%p278_p7)
}
   0xf   :  { %s285_s28 = smov 128   ;;  %s286_s29 = smov 8  }
  0x10   :  { %28 = dma.hbm_to_vmem [thread:$0]  %s363_s3, 1024, %s23_s19, [#allocation3], %s285_s28, %s285_s28, %s286_s29  }
  0x11   :  { %282 = dma.done.wait [#allocation3], 1024  }
  0x12   :  { %283 = vsyncadd [#allocation3], 4294966272  ;;  %v287_v0 = vmov 0   ;;  %v288_v1 = vmov 2   ;;  %v289_v2 = vmov 0.0|0.0   ;;  %v34_v3 = vld [vmem:[%s360_s0] sm:$0xff] }
  0x13   :  { %251 = vset.pattern.permute.xlu0 %v287_v0  ;;  %253 = vset.pattern.permute.xlu1 %v288_v1  ;;  %v88_v4 = vld [vmem:[#allocation2] sm:$0xff]  ;;  %v89_v5 = vld [vmem:[#allocation2 + $0x8] sm:$0xff]  ;;  %v90_v7 = vld [vmem:[#allocation2 + $0x10] sm:$0xff]  ;;  %v290_v10 = vmov 1   ;;  %v291_v11 = vmov 3   ;;  %vm292_vm0 = vmmov 0  }
  0x14   :  { %229 = vmatprep.subr.bf16.mxu0 %v289_v2  ;;  %39 = vperm.xlu0 %251, %v34_v3   ;;  %v230_v6 = vpack.c.bf16 %v89_v5, %v88_v4  ;;  %v91_v8 = vld [vmem:[#allocation2 + $0x18] sm:$0xff]  ;;  %v92_v12 = vld [vmem:[#allocation2 + $0x20] sm:$0xff]  ;;  %v93_v13 = vld [vmem:[#allocation2 + $0x28] sm:$0xff]  ;;  %v293_v18 = vmov 0.0   ;;  %vm103_vm1 = vcmask 523264   ;;  %vm187_vm2 = vcmask 64512  }
  0x15   :  { %67 = vperm.xlu1 %253, %v34_v3   ;;  %v233_v9 = vpack.c.bf16 %v91_v8, %v90_v7  ;;  %v236_v14 = vpack.c.bf16 %v93_v13, %v92_v12  ;;  %v94_v15 = vld [vmem:[#allocation2 + $0x30] sm:$0xff]  ;;  %v95_v16 = vld [vmem:[#allocation2 + $0x38] sm:$0xff]  ;;  %226 = vmatprep.mubr.msk.f32.mxu0 %vm292_vm0, %v293_v18  ;;  %v194_v19 = vld [vmem:[%s361_s1] ss:$0 sm:$0xff] }
  0x16   :  { %231 = vmatpush3.bf16.msra.mxu0 %v230_v6  ;;  %v239_v17 = vpack.c.bf16 %v95_v16, %v94_v15  ;;  %v195_v23 = vld [vmem:[%s362_s2] ss:$0 sm:$0xff]  ;;  %v196_v24 = vld [vmem:[%s361_s1 + $0x1] ss:$0 sm:$0xff]  ;;  %v197_v25 = vld [vmem:[%s361_s1 + $0x2] ss:$0 sm:$0xff] }
  0x17   :  { %232 = vmatprep.subr.bf16.mxu0 %v289_v2  ;;  %v198_v27 = vld [vmem:[%s361_s1 + $0x3] ss:$0 sm:$0xff]  ;;  %v199_v37 = vld [vmem:[%s364_s4] ss:$0 sm:$0xff] }
  0x18   :  { %252 = vset.pattern.permute.xlu0 %v290_v10 }
  0x19   :  { %254 = vset.pattern.permute.xlu1 %v291_v11  ;;  %56 = vperm.xlu0 %252, %v34_v3  }
  0x1a   :  { %78 = vperm.xlu1 %254, %v34_v3   ;;  %234 = vmatpush3.bf16.msra.mxu0 %v233_v9 }
  0x1b   :  { %235 = vmatprep.subr.bf16.mxu0 %v289_v2 }
  0x1d   :  { %255 = vset.pattern.permute.xlu0 %v291_v11 }
  0x1e   :  { %237 = vmatpush3.bf16.msra.mxu0 %v236_v14 }
  0x1f   :  { %238 = vmatprep.subr.bf16.mxu0 %v289_v2 }
  0x22   :  { %240 = vmatpush3.bf16.msra.mxu0 %v239_v17 }
  0x93   :  { %v40_v20 = vpop.permute.xlu0 %39 }
  0x94   :  { %v68_v21 = vpop.permute.xlu1 %67  ;;  %v46_v22 = vmul.f32 %v194_v19, %v40_v20 }
  0x95   :  { %v74_v31 = vmul.f32 %v197_v25, %v68_v21 }
  0x96   :  { %v53_v29 = vadd.f32 %v195_v23, %v46_v22 }
  0x98   :  { %v57_v26 = vpop.permute.xlu0 %56 }
  0x99   :  { %v79_v28 = vpop.permute.xlu1 %78  ;;  %v63_v30 = vmul.f32 %v196_v24, %v57_v26 }
  0x9a   :  { %v85_v33 = vmul.f32 %v198_v27, %v79_v28 }
  0x9b   :  { %v64_v32 = vadd.f32 %v63_v30, %v53_v29 }
  0x9d   :  { %v75_v34 = vadd.f32 %v74_v31, %v64_v32 }
  0x9f   :  { %v86_v35 = vadd.f32 %v85_v33, %v75_v34 }
  0xa1   :  { %v87_v36 = vmax.f32 %v86_v35, 0.0 }
  0xa3   :  { %227 = vmatmul.mubr.msk.f32.vlgmr.msra.gmra.mrb[0].mxu0 %vm103_vm1, %v87_v36 }
 0x176   :  { %v173_v38 = vpop.f32.mrb[0].mxu0 }
 0x177   :  { %v174_v39 = vadd.f32 %v199_v37, %v173_v38  ;;  %v228_v40 = vpop.f32.mrb[1].mxu0 }
 0x179   :  { %177 = vmax.xlane.f32.xlu1 %v174_v39 }
 0x206   :  { %v178_v41 = vpop.xlane.xlu1 %177 }
 0x207   :  { %v179_v42 = vsub.f32 %v174_v39, %v178_v41 }
 0x209   :  { %v180_v43 = vmul.f32 1.442695, %v179_v42 }
 0x20b   :  { %256 = vpow2.f32 %v180_v43 }
 0x215   :  { %v257_v44 = vpop.eup %256 }
 0x216   :  { %182 = vadd.xlane.f32.xlu0 %v257_v44 }
 0x2a3   :  { %v183_v45 = vpop.xlane.xlu0 %182 }
 0x2a4   :  { %258 = vlog2.f32 %v183_v45 }
 0x2ae   :  { %v259_v46 = vpop.eup %258 }
 0x2af   :  { %v185_v47 = vmul.f32 0.6931472, %v259_v46 }
 0x2b1   :  { %v186_v48 = vsub.f32 %v179_v42, %v185_v47 }
 0x2b3   :  { %188 = vst.msk [vmem:[%s365_s5] sm:$0xff] %vm187_vm2, %v186_v48 }
 0x2b4   :  { %193 = vsyncpa [#allocation3], 1 }

</bundles_post_ra>
